<compile_context>
chip_gen: v6e
topology: v6e:2x2x1
jax: 0.10.0
libtpu: 0.0.40
codegen_flags: <defaults>
</compile_context>

<pallas_src>
import functools

import jax
import jax.numpy as jnp
from jax.experimental import pallas as pl
from jax.experimental.pallas import tpu as pltpu


def _round_up(x: int, m: int) -> int:
    return ((x + m - 1) // m) * m


def _mlp(h, wb_refs, num_layers):
    """[Linear -> ReLU -> Dropout(identity)]* with f32 accumulation, bf16 MXU inputs."""
    # TODO(synk): training-mode dropout would need pltpu.prng_seed + prng_random_bits;
    #             identity here (eval semantics).
    for l in range(num_layers):
        w = wb_refs[2 * l][...]        # (d_in_pad, d_out_pad), compute dtype (bf16)
        b = wb_refs[2 * l + 1][...]    # (1, d_out_pad), f32
        h = jnp.dot(h.astype(w.dtype), w, preferred_element_type=jnp.float32) + b
        h = jnp.maximum(h, 0.0)
    return h


def _item_tower_resident_kernel(ids_ref, table_ref, *refs, num_layers, tb, n_items):
    """Table resident in VMEM: gather rows with dynamic sublane loads, no DMA."""
    *wb, out_ref, emb_buf = refs
    base = pl.program_id(0) * tb
    for r in range(tb):                          # static unrolled loop, dynamic src index
        idx = jnp.clip(ids_ref[base + r], 0, n_items - 1)   # clamp OOB ids (nn.Embedding would error)
        emb_buf[pl.ds(r, 1), :] = table_ref[pl.ds(idx, 1), :]
    h = _mlp(emb_buf[...], wb, num_layers)
    out_ref[...] = h.astype(out_ref.dtype)       # lane-dense (tb, H_pad) store


def _item_tower_hbm_kernel(ids_ref, table_hbm, *refs, num_layers, tb, cb, n_items):
    """Table in HBM: per-row gather DMAs, double-buffered across chunks within the step
    so the gather of chunk c+1 overlaps the MLP compute of chunk c."""
    *wb, out_ref, emb_buf, sem = refs            # emb_buf: (2, cb, E), sem: DMA (2,)
    n_chunks = tb // cb
    base = pl.program_id(0) * tb
    copies = [None, None]                        # python bookkeeping (fully unrolled)

    def start_chunk(c):
        slot = c % 2
        cps = []
        for r in range(cb):
            idx = jnp.clip(ids_ref[base + c * cb + r], 0, n_items - 1)
            cp = pltpu.make_async_copy(table_hbm.at[idx], emb_buf.at[slot, r], sem.at[slot])
            cp.start()
            cps.append(cp)
        copies[slot] = cps

    start_chunk(0)
    for c in range(n_chunks):
        if c + 1 < n_chunks:
            start_chunk(c + 1)                   # prefetch next chunk (other slot) first
        for cp in copies[c % 2]:                 # shared per-slot sem: all waits before use
            cp.wait()
        h = _mlp(emb_buf[c % 2], wb, num_layers)
        out_ref[pl.ds(c * cb, cb), :] = h.astype(out_ref.dtype)


def item_tower_forward(item_ids, table, weights, biases, *,
                       block_b=128, compute_dtype=jnp.bfloat16,
                       resident_table_bytes=4 << 20, force_hbm_gather=False):
    """item_ids: (B,) int; table: (N, E); weights[l]: (d_l, d_{l+1}); biases[l]: (d_{l+1},).
    Returns (B, hidden_dims[-1]) float32 (eval-mode forward of ItemTower)."""
    assert len(weights) == len(biases) and len(weights) >= 1
    B = int(item_ids.shape[0])
    N, E = (int(s) for s in table.shape)
    num_layers = len(weights)
    out_dim = int(weights[-1].shape[1])

    # ---- Pad every layer width to a multiple of 128 (lane-dense matmuls / bias adds /
    # ---- output store). Zero padding is exact: ReLU(0 + 0) = 0, zero rows contribute 0.
    dims = [E] + [int(w.shape[1]) for w in weights]
    dims_p = [dims[0]] + [_round_up(d, 128) for d in dims[1:]]
    ws, bs = [], []
    for l, (w, b) in enumerate(zip(weights, biases)):
        w = jnp.pad(w, ((0, dims_p[l] - dims[l]), (0, dims_p[l + 1] - dims[l + 1])))
        b = jnp.pad(b, ((0, dims_p[l + 1] - dims[l + 1]),))
        ws.append(w.astype(compute_dtype))                    # bf16 weights -> 1-pass MXU
        bs.append(b.reshape(1, -1).astype(jnp.float32))
    out_dim_p = dims_p[-1]

    # ---- Batch tiling: tb multiple of 8, <= block_b, chosen so the grid has >= 2 steps
    # ---- whenever possible (megacore sharding of the "parallel" batch axis on v7x).
    B8 = _round_up(max(B, 1), 8)
    tb = min(block_b, max(8, _round_up((B8 + 1) // 2, 8)))
    B_p = _round_up(B, tb)
    grid = (B_p // tb,)

    ids = item_ids.astype(jnp.int32)
    if B_p != B:
        ids = jnp.pad(ids, ((0, B_p - B),))                   # padded rows gather row 0, sliced off
    # TODO(synk): for very large B (O(100k+)) the whole scalar-prefetched ids array may
    #             overflow SMEM; switch to a per-tile SMEM BlockSpec for ids in that case.

    itemsize = jnp.dtype(table.dtype).itemsize
    table_bytes = N * E * itemsize
    resident = (not force_hbm_gather) and table_bytes <= resident_table_bytes

    cb = 8
    if not resident:
        for cand in (32, 16, 8):                              # chunk size for in-step DMA overlap
            if tb % cand == 0:
                cb = cand
                break

    def build_and_run(use_buffered):
        const_kwargs = dict(pipeline_mode=pl.Buffered(1)) if use_buffered else {}
        wb_specs = []
        for l in range(num_layers):
            wb_specs.append(pl.BlockSpec(tuple(ws[l].shape), lambda i, ids_r: (0, 0), **const_kwargs))
            wb_specs.append(pl.BlockSpec(tuple(bs[l].shape), lambda i, ids_r: (0, 0), **const_kwargs))
        out_spec = pl.BlockSpec((tb, out_dim_p), lambda i, ids_r: (i, 0))

        param_bytes = (sum(int(w.size) * jnp.dtype(w.dtype).itemsize for w in ws)
                       + sum(int(b.size) * 4 for b in bs))
        param_mult = 1 if use_buffered else 2

        if resident:
            table_spec = pl.BlockSpec((N, E), lambda i, ids_r: (0, 0), **const_kwargs)
            scratch = [pltpu.VMEM((tb, E), table.dtype)]
            kernel = functools.partial(_item_tower_resident_kernel,
                                       num_layers=num_layers, tb=tb, n_items=N)
            need = (param_mult * (param_bytes + table_bytes)
                    + 2 * tb * out_dim_p * 4 + tb * E * itemsize)
        else:
            table_spec = pl.BlockSpec(memory_space=pl.ANY)
            scratch = [pltpu.VMEM((2, cb, E), table.dtype),   # double-buffered gather chunks
                       pltpu.SemaphoreType.DMA((2,))]         # one shared DMA sem per slot
            kernel = functools.partial(_item_tower_hbm_kernel,
                                       num_layers=num_layers, tb=tb, cb=cb, n_items=N)
            need = (param_mult * param_bytes
                    + 2 * tb * out_dim_p * 4 + 2 * cb * E * itemsize)

        vmem_limit = int(min(max(2 * need, 16 << 20), 48 << 20))   # v7x-safe cap

        grid_spec = pltpu.PrefetchScalarGridSpec(
            num_scalar_prefetch=1,
            grid=grid,
            in_specs=[table_spec] + wb_specs,
            out_specs=out_spec,
            scratch_shapes=scratch,
        )
        return pl.pallas_call(
            kernel,
            out_shape=jax.ShapeDtypeStruct((B_p, out_dim_p), jnp.float32),
            grid_spec=grid_spec,
            compiler_params=pltpu.CompilerParams(
                dimension_semantics=("parallel",),
                vmem_limit_bytes=vmem_limit,
            ),
        )(ids, table, *[x for pair in zip(ws, bs) for x in pair])

    try:
        out = build_and_run(True)    # single-buffer the constant weight/bias/table blocks
    except Exception:
        out = build_and_run(False)   # fallback if pl.Buffered(1) is rejected

    return out[:B, :out_dim]


def _reference(item_ids, table, weights, biases, compute_dtype=None):
    """Pure-JAX reference. compute_dtype mirrors the kernel's bf16-MXU/f32-accum math."""
    x = table[item_ids]
    for w, b in zip(weights, biases):
        if compute_dtype is not None:
            y = jnp.dot(x.astype(compute_dtype), w.astype(compute_dtype),
                        preferred_element_type=jnp.float32)
        else:
            y = x @ w
        x = jnp.maximum(y + b, 0.0)
    return x


if __name__ == "__main__":
    key = jax.random.PRNGKey(0)

    def make_params(k, num_items, embedding_dim, hidden_dims):
        ks = jax.random.split(k, 1 + 2 * len(hidden_dims))
        table = jax.random.normal(ks[0], (num_items, embedding_dim), jnp.float32)
        ws, bs, din = [], [], embedding_dim
        for l, h in enumerate(hidden_dims):
            ws.append(jax.random.normal(ks[1 + 2 * l], (din, h), jnp.float32) * 0.1)
            bs.append(jax.random.normal(ks[2 + 2 * l], (h,), jnp.float32) * 0.1)
            din = h
        return table, ws, bs

    def check(name, k, num_items, embedding_dim, hidden_dims, batch, **kw):
        k_p, k_i = jax.random.split(k)
        table, ws, bs = make_params(k_p, num_items, embedding_dim, hidden_dims)
        ids = jax.random.randint(k_i, (batch,), 0, num_items, dtype=jnp.int32)
        out = jax.block_until_ready(item_tower_forward(ids, table, ws, bs, **kw))
        assert out.shape == (batch, hidden_dims[-1]), (name, out.shape)
        ref_bf16 = _reference(ids, table, ws, bs, compute_dtype=jnp.bfloat16)
        ref_f32 = _reference(ids, table, ws, bs)
        err = float(jnp.max(jnp.abs(out - ref_bf16)))
        assert jnp.allclose(out, ref_bf16, atol=5e-3, rtol=5e-3), (name, err)
        assert jnp.allclose(out, ref_f32, atol=1e-1, rtol=1e-1), name

    k1, k2 = jax.random.split(key)
    # 1) Demo config matching ItemTower(64, 32, [64, 32], dropout): tiny table ->
    #    VMEM-resident gather path.
    check("resident", k1, num_items=64, embedding_dim=32, hidden_dims=[64, 32], batch=8)
    # 2) Bigger batch, table forced through the HBM double-buffered DMA-gather path.
    check("hbm_gather", k2, num_items=4096, embedding_dim=64, hidden_dims=[128, 96],
          batch=192, force_hbm_gather=True)

    print("KERNEL_OK")
</pallas_src>

<mosaic_0001>
module attributes {stable_mosaic.version = 11 : i64} {
  func.func @_item_tower_resident_kernel(%arg0: i32, %arg1: memref<8xi32, #tpu.memory_space<smem>>, %arg2: memref<64x32xf32, #tpu.memory_space<vmem>>, %arg3: memref<32x128xbf16, #tpu.memory_space<vmem>>, %arg4: memref<1x128xf32, #tpu.memory_space<vmem>>, %arg5: memref<128x128xbf16, #tpu.memory_space<vmem>>, %arg6: memref<1x128xf32, #tpu.memory_space<vmem>>, %arg7: memref<8x128xf32, #tpu.memory_space<vmem>>, %arg8: memref<8x32xf32, #tpu.memory_space<vmem>>) attributes {dimension_semantics = [#tpu.dimension_semantics<parallel>], iteration_bounds = array<i64: 1>, scalar_prefetch = 1 : i64, scratch_operands = 1 : i64, tpu.core_type = #tpu.core_type<tc>, window_params = [{pipeline_mode = #tpu.pipeline_mode<synchronous>, transform_indices = @transform_0, window_bounds = array<i64: 64, 32>}, {pipeline_mode = #tpu.pipeline_mode<synchronous>, transform_indices = @transform_1, window_bounds = array<i64: 32, 128>}, {pipeline_mode = #tpu.pipeline_mode<synchronous>, transform_indices = @transform_2, window_bounds = array<i64: 1, 128>}, {pipeline_mode = #tpu.pipeline_mode<synchronous>, transform_indices = @transform_3, window_bounds = array<i64: 128, 128>}, {pipeline_mode = #tpu.pipeline_mode<synchronous>, transform_indices = @transform_4, window_bounds = array<i64: 1, 128>}, {transform_indices = @transform_5, window_bounds = array<i64: 8, 128>}]} {
    %c8_i32 = arith.constant 8 : i32
    %0 = arith.muli %arg0, %c8_i32 : i32
    %c0_i32 = arith.constant 0 : i32
    %1 = arith.addi %0, %c0_i32 : i32
    %2 = arith.index_cast %1 : i32 to index
    %3 = memref.load %arg1[%2] : memref<8xi32, #tpu.memory_space<smem>>
    %c0_i32_0 = arith.constant 0 : i32
    %c63_i32 = arith.constant 63 : i32
    %4 = arith.maxsi %c0_i32_0, %3 : i32
    %5 = arith.minsi %c63_i32, %4 : i32
    %6 = arith.index_cast %5 : i32 to index
    %c0 = arith.constant 0 : index
    %7 = vector.load %arg2[%6, %c0] : memref<64x32xf32, #tpu.memory_space<vmem>>, vector<1x32xf32>
    %c0_1 = arith.constant 0 : index
    %c0_2 = arith.constant 0 : index
    %8 = vector.load %arg8[%c0_1, %c0_2] : memref<8x32xf32, #tpu.memory_space<vmem>>, vector<1x32xf32>
    tpu.vector_store %arg8[%c0_1, %c0_2], %7 {strides = array<i32>} : memref<8x32xf32, #tpu.memory_space<vmem>>, vector<1x32xf32>,
    %c1_i32 = arith.constant 1 : i32
    %9 = arith.addi %0, %c1_i32 : i32
    %10 = arith.index_cast %9 : i32 to index
    %11 = memref.load %arg1[%10] : memref<8xi32, #tpu.memory_space<smem>>
    %c0_i32_3 = arith.constant 0 : i32
    %c63_i32_4 = arith.constant 63 : i32
    %12 = arith.maxsi %c0_i32_3, %11 : i32
    %13 = arith.minsi %c63_i32_4, %12 : i32
    %14 = arith.index_cast %13 : i32 to index
    %c0_5 = arith.constant 0 : index
    %15 = vector.load %arg2[%14, %c0_5] : memref<64x32xf32, #tpu.memory_space<vmem>>, vector<1x32xf32>
    %c1 = arith.constant 1 : index
    %c0_6 = arith.constant 0 : index
    %16 = vector.load %arg8[%c1, %c0_6] : memref<8x32xf32, #tpu.memory_space<vmem>>, vector<1x32xf32>
    tpu.vector_store %arg8[%c1, %c0_6], %15 {strides = array<i32>} : memref<8x32xf32, #tpu.memory_space<vmem>>, vector<1x32xf32>,
    %c2_i32 = arith.constant 2 : i32
    %17 = arith.addi %0, %c2_i32 : i32
    %18 = arith.index_cast %17 : i32 to index
    %19 = memref.load %arg1[%18] : memref<8xi32, #tpu.memory_space<smem>>
    %c0_i32_7 = arith.constant 0 : i32
    %c63_i32_8 = arith.constant 63 : i32
    %20 = arith.maxsi %c0_i32_7, %19 : i32
    %21 = arith.minsi %c63_i32_8, %20 : i32
    %22 = arith.index_cast %21 : i32 to index
    %c0_9 = arith.constant 0 : index
    %23 = vector.load %arg2[%22, %c0_9] : memref<64x32xf32, #tpu.memory_space<vmem>>, vector<1x32xf32>
    %c2 = arith.constant 2 : index
    %c0_10 = arith.constant 0 : index
    %24 = vector.load %arg8[%c2, %c0_10] : memref<8x32xf32, #tpu.memory_space<vmem>>, vector<1x32xf32>
    tpu.vector_store %arg8[%c2, %c0_10], %23 {strides = array<i32>} : memref<8x32xf32, #tpu.memory_space<vmem>>, vector<1x32xf32>,
    %c3_i32 = arith.constant 3 : i32
    %25 = arith.addi %0, %c3_i32 : i32
    %26 = arith.index_cast %25 : i32 to index
    %27 = memref.load %arg1[%26] : memref<8xi32, #tpu.memory_space<smem>>
    %c0_i32_11 = arith.constant 0 : i32
    %c63_i32_12 = arith.constant 63 : i32
    %28 = arith.maxsi %c0_i32_11, %27 : i32
    %29 = arith.minsi %c63_i32_12, %28 : i32
    %30 = arith.index_cast %29 : i32 to index
    %c0_13 = arith.constant 0 : index
    %31 = vector.load %arg2[%30, %c0_13] : memref<64x32xf32, #tpu.memory_space<vmem>>, vector<1x32xf32>
    %c3 = arith.constant 3 : index
    %c0_14 = arith.constant 0 : index
    %32 = vector.load %arg8[%c3, %c0_14] : memref<8x32xf32, #tpu.memory_space<vmem>>, vector<1x32xf32>
    tpu.vector_store %arg8[%c3, %c0_14], %31 {strides = array<i32>} : memref<8x32xf32, #tpu.memory_space<vmem>>, vector<1x32xf32>,
    %c4_i32 = arith.constant 4 : i32
    %33 = arith.addi %0, %c4_i32 : i32
    %34 = arith.index_cast %33 : i32 to index
    %35 = memref.load %arg1[%34] : memref<8xi32, #tpu.memory_space<smem>>
    %c0_i32_15 = arith.constant 0 : i32
    %c63_i32_16 = arith.constant 63 : i32
    %36 = arith.maxsi %c0_i32_15, %35 : i32
    %37 = arith.minsi %c63_i32_16, %36 : i32
    %38 = arith.index_cast %37 : i32 to index
    %c0_17 = arith.constant 0 : index
    %39 = vector.load %arg2[%38, %c0_17] : memref<64x32xf32, #tpu.memory_space<vmem>>, vector<1x32xf32>
    %c4 = arith.constant 4 : index
    %c0_18 = arith.constant 0 : index
    %40 = vector.load %arg8[%c4, %c0_18] : memref<8x32xf32, #tpu.memory_space<vmem>>, vector<1x32xf32>
    tpu.vector_store %arg8[%c4, %c0_18], %39 {strides = array<i32>} : memref<8x32xf32, #tpu.memory_space<vmem>>, vector<1x32xf32>,
    %c5_i32 = arith.constant 5 : i32
    %41 = arith.addi %0, %c5_i32 : i32
    %42 = arith.index_cast %41 : i32 to index
    %43 = memref.load %arg1[%42] : memref<8xi32, #tpu.memory_space<smem>>
    %c0_i32_19 = arith.constant 0 : i32
    %c63_i32_20 = arith.constant 63 : i32
    %44 = arith.maxsi %c0_i32_19, %43 : i32
    %45 = arith.minsi %c63_i32_20, %44 : i32
    %46 = arith.index_cast %45 : i32 to index
    %c0_21 = arith.constant 0 : index
    %47 = vector.load %arg2[%46, %c0_21] : memref<64x32xf32, #tpu.memory_space<vmem>>, vector<1x32xf32>
    %c5 = arith.constant 5 : index
    %c0_22 = arith.constant 0 : index
    %48 = vector.load %arg8[%c5, %c0_22] : memref<8x32xf32, #tpu.memory_space<vmem>>, vector<1x32xf32>
    tpu.vector_store %arg8[%c5, %c0_22], %47 {strides = array<i32>} : memref<8x32xf32, #tpu.memory_space<vmem>>, vector<1x32xf32>,
    %c6_i32 = arith.constant 6 : i32
    %49 = arith.addi %0, %c6_i32 : i32
    %50 = arith.index_cast %49 : i32 to index
    %51 = memref.load %arg1[%50] : memref<8xi32, #tpu.memory_space<smem>>
    %c0_i32_23 = arith.constant 0 : i32
    %c63_i32_24 = arith.constant 63 : i32
    %52 = arith.maxsi %c0_i32_23, %51 : i32
    %53 = arith.minsi %c63_i32_24, %52 : i32
    %54 = arith.index_cast %53 : i32 to index
    %c0_25 = arith.constant 0 : index
    %55 = vector.load %arg2[%54, %c0_25] : memref<64x32xf32, #tpu.memory_space<vmem>>, vector<1x32xf32>
    %c6 = arith.constant 6 : index
    %c0_26 = arith.constant 0 : index
    %56 = vector.load %arg8[%c6, %c0_26] : memref<8x32xf32, #tpu.memory_space<vmem>>, vector<1x32xf32>
    tpu.vector_store %arg8[%c6, %c0_26], %55 {strides = array<i32>} : memref<8x32xf32, #tpu.memory_space<vmem>>, vector<1x32xf32>,
    %c7_i32 = arith.constant 7 : i32
    %57 = arith.addi %0, %c7_i32 : i32
    %58 = arith.index_cast %57 : i32 to index
    %59 = memref.load %arg1[%58] : memref<8xi32, #tpu.memory_space<smem>>
    %c0_i32_27 = arith.constant 0 : i32
    %c63_i32_28 = arith.constant 63 : i32
    %60 = arith.maxsi %c0_i32_27, %59 : i32
    %61 = arith.minsi %c63_i32_28, %60 : i32
    %62 = arith.index_cast %61 : i32 to index
    %c0_29 = arith.constant 0 : index
    %63 = vector.load %arg2[%62, %c0_29] : memref<64x32xf32, #tpu.memory_space<vmem>>, vector<1x32xf32>
    %c7 = arith.constant 7 : index
    %c0_30 = arith.constant 0 : index
    %64 = vector.load %arg8[%c7, %c0_30] : memref<8x32xf32, #tpu.memory_space<vmem>>, vector<1x32xf32>
    tpu.vector_store %arg8[%c7, %c0_30], %63 {strides = array<i32>} : memref<8x32xf32, #tpu.memory_space<vmem>>, vector<1x32xf32>,
    %c0_31 = arith.constant 0 : index
    %c0_32 = arith.constant 0 : index
    %65 = vector.load %arg8[%c0_31, %c0_32] : memref<8x32xf32, #tpu.memory_space<vmem>>, vector<8x32xf32>
    %c0_33 = arith.constant 0 : index
    %c0_34 = arith.constant 0 : index
    %66 = vector.load %arg3[%c0_33, %c0_34] : memref<32x128xbf16, #tpu.memory_space<vmem>>, vector<32x128xbf16>
    %c0_35 = arith.constant 0 : index
    %c0_36 = arith.constant 0 : index
    %67 = vector.load %arg4[%c0_35, %c0_36] : memref<1x128xf32, #tpu.memory_space<vmem>>, vector<1x128xf32>
    %68 = arith.truncf %65 : vector<8x32xf32> to vector<8x32xbf16>
    %cst = arith.constant dense<0.000000e+00> : vector<8x128xf32>
    %69 = tpu.matmul %68, %66, %cst {dimension_numbers = #tpu.dot_dimension_numbers<[1], [0], [0], [1], [0, 0, 1, 1], [], []>} : vector<8x32xbf16>, vector<32x128xbf16>, vector<8x128xf32> -> vector<8x128xf32>
    %70 = vector.broadcast %67 : vector<1x128xf32> to vector<8x128xf32>
    %71 = arith.addf %69, %70 : vector<8x128xf32>
    %cst_37 = arith.constant 0.000000e+00 : f32
    %72 = vector.broadcast %cst_37 : f32 to vector<8x128xf32>
    %73 = arith.maximumf %71, %72 : vector<8x128xf32>
    %c0_38 = arith.constant 0 : index
    %c0_39 = arith.constant 0 : index
    %74 = vector.load %arg5[%c0_38, %c0_39] : memref<128x128xbf16, #tpu.memory_space<vmem>>, vector<128x128xbf16>
    %c0_40 = arith.constant 0 : index
    %c0_41 = arith.constant 0 : index
    %75 = vector.load %arg6[%c0_40, %c0_41] : memref<1x128xf32, #tpu.memory_space<vmem>>, vector<1x128xf32>
    %76 = arith.truncf %73 : vector<8x128xf32> to vector<8x128xbf16>
    %cst_42 = arith.constant dense<0.000000e+00> : vector<8x128xf32>
    %77 = tpu.matmul %76, %74, %cst_42 {dimension_numbers = #tpu.dot_dimension_numbers<[1], [0], [0], [1], [0, 0, 1, 1], [], []>} : vector<8x128xbf16>, vector<128x128xbf16>, vector<8x128xf32> -> vector<8x128xf32>
    %78 = vector.broadcast %75 : vector<1x128xf32> to vector<8x128xf32>
    %79 = arith.addf %77, %78 : vector<8x128xf32>
    %cst_43 = arith.constant 0.000000e+00 : f32
    %80 = vector.broadcast %cst_43 : f32 to vector<8x128xf32>
    %81 = arith.maximumf %79, %80 : vector<8x128xf32>
    %c0_44 = arith.constant 0 : index
    %c0_45 = arith.constant 0 : index
    %82 = vector.load %arg7[%c0_44, %c0_45] : memref<8x128xf32, #tpu.memory_space<vmem>>, vector<8x128xf32>
    tpu.vector_store %arg7[%c0_44, %c0_45], %81 {strides = array<i32>} : memref<8x128xf32, #tpu.memory_space<vmem>>, vector<8x128xf32>,
    return
  }
  func.func @transform_0(%arg0: i32, %arg1: memref<8xi32, #tpu.memory_space<smem>>) -> (i32, i32) {
    %c0_i32 = arith.constant 0 : i32
    %c0_i32_0 = arith.constant 0 : i32
    %c0_i32_1 = arith.constant 0 : i32
    return %c0_i32, %c0_i32_0 : i32, i32
  }
  func.func @transform_1(%arg0: i32, %arg1: memref<8xi32, #tpu.memory_space<smem>>) -> (i32, i32) {
    %c0_i32 = arith.constant 0 : i32
    %c0_i32_0 = arith.constant 0 : i32
    %c0_i32_1 = arith.constant 0 : i32
    return %c0_i32, %c0_i32_0 : i32, i32
  }
  func.func @transform_2(%arg0: i32, %arg1: memref<8xi32, #tpu.memory_space<smem>>) -> (i32, i32) {
    %c0_i32 = arith.constant 0 : i32
    %c0_i32_0 = arith.constant 0 : i32
    %c0_i32_1 = arith.constant 0 : i32
    return %c0_i32, %c0_i32_0 : i32, i32
  }
  func.func @transform_3(%arg0: i32, %arg1: memref<8xi32, #tpu.memory_space<smem>>) -> (i32, i32) {
    %c0_i32 = arith.constant 0 : i32
    %c0_i32_0 = arith.constant 0 : i32
    %c0_i32_1 = arith.constant 0 : i32
    return %c0_i32, %c0_i32_0 : i32, i32
  }
  func.func @transform_4(%arg0: i32, %arg1: memref<8xi32, #tpu.memory_space<smem>>) -> (i32, i32) {
    %c0_i32 = arith.constant 0 : i32
    %c0_i32_0 = arith.constant 0 : i32
    %c0_i32_1 = arith.constant 0 : i32
    return %c0_i32, %c0_i32_0 : i32, i32
  }
  func.func @transform_5(%arg0: i32, %arg1: memref<8xi32, #tpu.memory_space<smem>>) -> (i32, i32) {
    %c0_i32 = arith.constant 0 : i32
    %c0_i32_0 = arith.constant 0 : i32
    return %arg0, %c0_i32 : i32, i32
  }
}

module attributes {stable_mosaic.version = 11 : i64} {
  func.func @_item_tower_resident_kernel(%arg0: i32, %arg1: memref<8xi32, #tpu.memory_space<smem>>, %arg2: memref<64x32xf32, #tpu.memory_space<vmem>>, %arg3: memref<32x128xbf16, #tpu.memory_space<vmem>>, %arg4: memref<1x128xf32, #tpu.memory_space<vmem>>, %arg5: memref<128x128xbf16, #tpu.memory_space<vmem>>, %arg6: memref<1x128xf32, #tpu.memory_space<vmem>>, %arg7: memref<8x128xf32, #tpu.memory_space<vmem>>, %arg8: memref<8x32xf32, #tpu.memory_space<vmem>>) attributes {dimension_semantics = [#tpu.dimension_semantics<parallel>], iteration_bounds = array<i64: 1>, scalar_prefetch = 1 : i64, scratch_operands = 1 : i64, tpu.core_type = #tpu.core_type<tc>, window_params = [{pipeline_mode = #tpu.pipeline_mode<synchronous>, transform_indices = @transform_0, window_bounds = array<i64: 64, 32>}, {pipeline_mode = #tpu.pipeline_mode<synchronous>, transform_indices = @transform_1, window_bounds = array<i64: 32, 128>}, {pipeline_mode = #tpu.pipeline_mode<synchronous>, transform_indices = @transform_2, window_bounds = array<i64: 1, 128>}, {pipeline_mode = #tpu.pipeline_mode<synchronous>, transform_indices = @transform_3, window_bounds = array<i64: 128, 128>}, {pipeline_mode = #tpu.pipeline_mode<synchronous>, transform_indices = @transform_4, window_bounds = array<i64: 1, 128>}, {transform_indices = @transform_5, window_bounds = array<i64: 8, 128>}]} {
    %c8_i32 = arith.constant 8 : i32
    %0 = arith.muli %arg0, %c8_i32 : i32
    %c0_i32 = arith.constant 0 : i32
    %1 = arith.addi %0, %c0_i32 : i32
    %2 = arith.index_cast %1 : i32 to index
    %3 = memref.load %arg1[%2] : memref<8xi32, #tpu.memory_space<smem>>
    %c0_i32_0 = arith.constant 0 : i32
    %c63_i32 = arith.constant 63 : i32
    %4 = arith.maxsi %c0_i32_0, %3 : i32
    %5 = arith.minsi %c63_i32, %4 : i32
    %6 = arith.index_cast %5 : i32 to index
    %c0 = arith.constant 0 : index
    %7 = vector.load %arg2[%6, %c0] : memref<64x32xf32, #tpu.memory_space<vmem>>, vector<1x32xf32>
    %c0_1 = arith.constant 0 : index
    %c0_2 = arith.constant 0 : index
    %8 = vector.load %arg8[%c0_1, %c0_2] : memref<8x32xf32, #tpu.memory_space<vmem>>, vector<1x32xf32>
    tpu.vector_store %arg8[%c0_1, %c0_2], %7 {strides = array<i32>} : memref<8x32xf32, #tpu.memory_space<vmem>>, vector<1x32xf32>,
    %c1_i32 = arith.constant 1 : i32
    %9 = arith.addi %0, %c1_i32 : i32
    %10 = arith.index_cast %9 : i32 to index
    %11 = memref.load %arg1[%10] : memref<8xi32, #tpu.memory_space<smem>>
    %c0_i32_3 = arith.constant 0 : i32
    %c63_i32_4 = arith.constant 63 : i32
    %12 = arith.maxsi %c0_i32_3, %11 : i32
    %13 = arith.minsi %c63_i32_4, %12 : i32
    %14 = arith.index_cast %13 : i32 to index
    %c0_5 = arith.constant 0 : index
    %15 = vector.load %arg2[%14, %c0_5] : memref<64x32xf32, #tpu.memory_space<vmem>>, vector<1x32xf32>
    %c1 = arith.constant 1 : index
    %c0_6 = arith.constant 0 : index
    %16 = vector.load %arg8[%c1, %c0_6] : memref<8x32xf32, #tpu.memory_space<vmem>>, vector<1x32xf32>
    tpu.vector_store %arg8[%c1, %c0_6], %15 {strides = array<i32>} : memref<8x32xf32, #tpu.memory_space<vmem>>, vector<1x32xf32>,
    %c2_i32 = arith.constant 2 : i32
    %17 = arith.addi %0, %c2_i32 : i32
    %18 = arith.index_cast %17 : i32 to index
    %19 = memref.load %arg1[%18] : memref<8xi32, #tpu.memory_space<smem>>
    %c0_i32_7 = arith.constant 0 : i32
    %c63_i32_8 = arith.constant 63 : i32
    %20 = arith.maxsi %c0_i32_7, %19 : i32
    %21 = arith.minsi %c63_i32_8, %20 : i32
    %22 = arith.index_cast %21 : i32 to index
    %c0_9 = arith.constant 0 : index
    %23 = vector.load %arg2[%22, %c0_9] : memref<64x32xf32, #tpu.memory_space<vmem>>, vector<1x32xf32>
    %c2 = arith.constant 2 : index
    %c0_10 = arith.constant 0 : index
    %24 = vector.load %arg8[%c2, %c0_10] : memref<8x32xf32, #tpu.memory_space<vmem>>, vector<1x32xf32>
    tpu.vector_store %arg8[%c2, %c0_10], %23 {strides = array<i32>} : memref<8x32xf32, #tpu.memory_space<vmem>>, vector<1x32xf32>,
    %c3_i32 = arith.constant 3 : i32
    %25 = arith.addi %0, %c3_i32 : i32
    %26 = arith.index_cast %25 : i32 to index
    %27 = memref.load %arg1[%26] : memref<8xi32, #tpu.memory_space<smem>>
    %c0_i32_11 = arith.constant 0 : i32
    %c63_i32_12 = arith.constant 63 : i32
    %28 = arith.maxsi %c0_i32_11, %27 : i32
    %29 = arith.minsi %c63_i32_12, %28 : i32
    %30 = arith.index_cast %29 : i32 to index
    %c0_13 = arith.constant 0 : index
    %31 = vector.load %arg2[%30, %c0_13] : memref<64x32xf32, #tpu.memory_space<vmem>>, vector<1x32xf32>
    %c3 = arith.constant 3 : index
    %c0_14 = arith.constant 0 : index
    %32 = vector.load %arg8[%c3, %c0_14] : memref<8x32xf32, #tpu.memory_space<vmem>>, vector<1x32xf32>
    tpu.vector_store %arg8[%c3, %c0_14], %31 {strides = array<i32>} : memref<8x32xf32, #tpu.memory_space<vmem>>, vector<1x32xf32>,
    %c4_i32 = arith.constant 4 : i32
    %33 = arith.addi %0, %c4_i32 : i32
    %34 = arith.index_cast %33 : i32 to index
    %35 = memref.load %arg1[%34] : memref<8xi32, #tpu.memory_space<smem>>
    %c0_i32_15 = arith.constant 0 : i32
    %c63_i32_16 = arith.constant 63 : i32
    %36 = arith.maxsi %c0_i32_15, %35 : i32
    %37 = arith.minsi %c63_i32_16, %36 : i32
    %38 = arith.index_cast %37 : i32 to index
    %c0_17 = arith.constant 0 : index
    %39 = vector.load %arg2[%38, %c0_17] : memref<64x32xf32, #tpu.memory_space<vmem>>, vector<1x32xf32>
    %c4 = arith.constant 4 : index
    %c0_18 = arith.constant 0 : index
    %40 = vector.load %arg8[%c4, %c0_18] : memref<8x32xf32, #tpu.memory_space<vmem>>, vector<1x32xf32>
    tpu.vector_store %arg8[%c4, %c0_18], %39 {strides = array<i32>} : memref<8x32xf32, #tpu.memory_space<vmem>>, vector<1x32xf32>,
    %c5_i32 = arith.constant 5 : i32
    %41 = arith.addi %0, %c5_i32 : i32
    %42 = arith.index_cast %41 : i32 to index
    %43 = memref.load %arg1[%42] : memref<8xi32, #tpu.memory_space<smem>>
    %c0_i32_19 = arith.constant 0 : i32
    %c63_i32_20 = arith.constant 63 : i32
    %44 = arith.maxsi %c0_i32_19, %43 : i32
    %45 = arith.minsi %c63_i32_20, %44 : i32
    %46 = arith.index_cast %45 : i32 to index
    %c0_21 = arith.constant 0 : index
    %47 = vector.load %arg2[%46, %c0_21] : memref<64x32xf32, #tpu.memory_space<vmem>>, vector<1x32xf32>
    %c5 = arith.constant 5 : index
    %c0_22 = arith.constant 0 : index
    %48 = vector.load %arg8[%c5, %c0_22] : memref<8x32xf32, #tpu.memory_space<vmem>>, vector<1x32xf32>
    tpu.vector_store %arg8[%c5, %c0_22], %47 {strides = array<i32>} : memref<8x32xf32, #tpu.memory_space<vmem>>, vector<1x32xf32>,
    %c6_i32 = arith.constant 6 : i32
    %49 = arith.addi %0, %c6_i32 : i32
    %50 = arith.index_cast %49 : i32 to index
    %51 = memref.load %arg1[%50] : memref<8xi32, #tpu.memory_space<smem>>
    %c0_i32_23 = arith.constant 0 : i32
    %c63_i32_24 = arith.constant 63 : i32
    %52 = arith.maxsi %c0_i32_23, %51 : i32
    %53 = arith.minsi %c63_i32_24, %52 : i32
    %54 = arith.index_cast %53 : i32 to index
    %c0_25 = arith.constant 0 : index
    %55 = vector.load %arg2[%54, %c0_25] : memref<64x32xf32, #tpu.memory_space<vmem>>, vector<1x32xf32>
    %c6 = arith.constant 6 : index
    %c0_26 = arith.constant 0 : index
    %56 = vector.load %arg8[%c6, %c0_26] : memref<8x32xf32, #tpu.memory_space<vmem>>, vector<1x32xf32>
    tpu.vector_store %arg8[%c6, %c0_26], %55 {strides = array<i32>} : memref<8x32xf32, #tpu.memory_space<vmem>>, vector<1x32xf32>,
    %c7_i32 = arith.constant 7 : i32
    %57 = arith.addi %0, %c7_i32 : i32
    %58 = arith.index_cast %57 : i32 to index
    %59 = memref.load %arg1[%58] : memref<8xi32, #tpu.memory_space<smem>>
    %c0_i32_27 = arith.constant 0 : i32
    %c63_i32_28 = arith.constant 63 : i32
    %60 = arith.maxsi %c0_i32_27, %59 : i32
    %61 = arith.minsi %c63_i32_28, %60 : i32
    %62 = arith.index_cast %61 : i32 to index
    %c0_29 = arith.constant 0 : index
    %63 = vector.load %arg2[%62, %c0_29] : memref<64x32xf32, #tpu.memory_space<vmem>>, vector<1x32xf32>
    %c7 = arith.constant 7 : index
    %c0_30 = arith.constant 0 : index
    %64 = vector.load %arg8[%c7, %c0_30] : memref<8x32xf32, #tpu.memory_space<vmem>>, vector<1x32xf32>
    tpu.vector_store %arg8[%c7, %c0_30], %63 {strides = array<i32>} : memref<8x32xf32, #tpu.memory_space<vmem>>, vector<1x32xf32>,
    %c0_31 = arith.constant 0 : index
    %c0_32 = arith.constant 0 : index
    %65 = vector.load %arg8[%c0_31, %c0_32] : memref<8x32xf32, #tpu.memory_space<vmem>>, vector<8x32xf32>
    %c0_33 = arith.constant 0 : index
    %c0_34 = arith.constant 0 : index
    %66 = vector.load %arg3[%c0_33, %c0_34] : memref<32x128xbf16, #tpu.memory_space<vmem>>, vector<32x128xbf16>
    %c0_35 = arith.constant 0 : index
    %c0_36 = arith.constant 0 : index
    %67 = vector.load %arg4[%c0_35, %c0_36] : memref<1x128xf32, #tpu.memory_space<vmem>>, vector<1x128xf32>
    %68 = arith.truncf %65 : vector<8x32xf32> to vector<8x32xbf16>
    %cst = arith.constant dense<0.000000e+00> : vector<8x128xf32>
    %69 = tpu.matmul %68, %66, %cst {dimension_numbers = #tpu.dot_dimension_numbers<[1], [0], [0], [1], [0, 0, 1, 1], [], []>} : vector<8x32xbf16>, vector<32x128xbf16>, vector<8x128xf32> -> vector<8x128xf32>
    %70 = vector.broadcast %67 : vector<1x128xf32> to vector<8x128xf32>
    %71 = arith.addf %69, %70 : vector<8x128xf32>
    %cst_37 = arith.constant 0.000000e+00 : f32
    %72 = vector.broadcast %cst_37 : f32 to vector<8x128xf32>
    %73 = arith.maximumf %71, %72 : vector<8x128xf32>
    %c0_38 = arith.constant 0 : index
    %c0_39 = arith.constant 0 : index
    %74 = vector.load %arg5[%c0_38, %c0_39] : memref<128x128xbf16, #tpu.memory_space<vmem>>, vector<128x128xbf16>
    %c0_40 = arith.constant 0 : index
    %c0_41 = arith.constant 0 : index
    %75 = vector.load %arg6[%c0_40, %c0_41] : memref<1x128xf32, #tpu.memory_space<vmem>>, vector<1x128xf32>
    %76 = arith.truncf %73 : vector<8x128xf32> to vector<8x128xbf16>
    %cst_42 = arith.constant dense<0.000000e+00> : vector<8x128xf32>
    %77 = tpu.matmul %76, %74, %cst_42 {dimension_numbers = #tpu.dot_dimension_numbers<[1], [0], [0], [1], [0, 0, 1, 1], [], []>} : vector<8x128xbf16>, vector<128x128xbf16>, vector<8x128xf32> -> vector<8x128xf32>
    %78 = vector.broadcast %75 : vector<1x128xf32> to vector<8x128xf32>
    %79 = arith.addf %77, %78 : vector<8x128xf32>
    %cst_43 = arith.constant 0.000000e+00 : f32
    %80 = vector.broadcast %cst_43 : f32 to vector<8x128xf32>
    %81 = arith.maximumf %79, %80 : vector<8x128xf32>
    %c0_44 = arith.constant 0 : index
    %c0_45 = arith.constant 0 : index
    %82 = vector.load %arg7[%c0_44, %c0_45] : memref<8x128xf32, #tpu.memory_space<vmem>>, vector<8x128xf32>
    tpu.vector_store %arg7[%c0_44, %c0_45], %81 {strides = array<i32>} : memref<8x128xf32, #tpu.memory_space<vmem>>, vector<8x128xf32>,
    return
  }
  func.func @transform_0(%arg0: i32, %arg1: memref<8xi32, #tpu.memory_space<smem>>) -> (i32, i32) {
    %c0_i32 = arith.constant 0 : i32
    %c0_i32_0 = arith.constant 0 : i32
    %c0_i32_1 = arith.constant 0 : i32
    return %c0_i32, %c0_i32_0 : i32, i32
  }
  func.func @transform_1(%arg0: i32, %arg1: memref<8xi32, #tpu.memory_space<smem>>) -> (i32, i32) {
    %c0_i32 = arith.constant 0 : i32
    %c0_i32_0 = arith.constant 0 : i32
    %c0_i32_1 = arith.constant 0 : i32
    return %c0_i32, %c0_i32_0 : i32, i32
  }
  func.func @transform_2(%arg0: i32, %arg1: memref<8xi32, #tpu.memory_space<smem>>) -> (i32, i32) {
    %c0_i32 = arith.constant 0 : i32
    %c0_i32_0 = arith.constant 0 : i32
    %c0_i32_1 = arith.constant 0 : i32
    return %c0_i32, %c0_i32_0 : i32, i32
  }
  func.func @transform_3(%arg0: i32, %arg1: memref<8xi32, #tpu.memory_space<smem>>) -> (i32, i32) {
    %c0_i32 = arith.constant 0 : i32
    %c0_i32_0 = arith.constant 0 : i32
    %c0_i32_1 = arith.constant 0 : i32
    return %c0_i32, %c0_i32_0 : i32, i32
  }
  func.func @transform_4(%arg0: i32, %arg1: memref<8xi32, #tpu.memory_space<smem>>) -> (i32, i32) {
    %c0_i32 = arith.constant 0 : i32
    %c0_i32_0 = arith.constant 0 : i32
    %c0_i32_1 = arith.constant 0 : i32
    return %c0_i32, %c0_i32_0 : i32, i32
  }
  func.func @transform_5(%arg0: i32, %arg1: memref<8xi32, #tpu.memory_space<smem>>) -> (i32, i32) {
    %c0_i32 = arith.constant 0 : i32
    %c0_i32_0 = arith.constant 0 : i32
    return %arg0, %c0_i32 : i32, i32
  }
}

</mosaic_0001>

<bundles_post_ra>
// kernel: tpu_custom_call.1
= control target key start
LH: loop header
LB: loop body
LE: loop exit
PB: predicated region body
PF: predicated region fallthrough
CT: control target
= control target key end

     0   :  { %s619_s0 = inlined_call_operand.vmem [shape: s32[8], index: 0, kind: input, shape index: {}]   ;;  %s620_s1 = inlined_call_operand.vmem [shape: f32[64,32], index: 1, kind: input, shape index: {}]   ;;  %s621_s2 = inlined_call_operand.vmem [shape: bf16[32,128], index: 2, kind: input, shape index: {}]   ;;  %s622_s3 = inlined_call_operand.vmem [shape: f32[1,128], index: 3, kind: input, shape index: {}]   ;;  %s623_s4 = inlined_call_operand.vmem [shape: bf16[128,128], index: 4, kind: input, shape index: {}]   ;;  %s624_s5 = inlined_call_operand.vmem [shape: f32[1,128], index: 5, kind: input, shape index: {}]   ;;  %s625_s6 = inlined_call_operand.hbm [shape: f32[8,128], index: 6, kind: output, shape index: {}]  }
   0x1   :  { %s11_s23 = sshll.u32 %s619_s0, 4  ;;  %s12_s23 = int_to_ptr.vmem [resolvable:$true] %s11_s23 }
   0x2   :  { %s438_s24 = scalar_lea.vmem %s12_s23, 16  ;;  %p443_p1 = scmp.lt.s32.totalorder %s12_s23, %s12_s23 }
   0x3   :  { %p439_p0 = scmp.ne.s32.totalorder %s12_s23, %s438_s24  ;;  %p444_p2 = scmp.lt.s32.totalorder %s438_s24, %s438_s24 }
   0x5   :  { %p445_p3 = por %p444_p2, %p443_p1 }
   0x7   :  { %p446_p4 = pnand %p445_p3, %p439_p0 }
   0x9   :  { %449 = shalt.err (!%p446_p4)  }
   0xa   :  { %s474_s25 = smov [#allocation4]  }
   0xb   :  { %14 = dma.vmem_to_smem %s12_s23, 16, %s474_s25, [#allocation3] }
   0xc   :  { %470 = dma.done.wait [#allocation3], 16 }
   0xd   :  { %471 = vsyncadd [#allocation3], 4294967280 }
   0xe   :  { %16 = sfence }
   0xf   :  { %v428_v0 = vld [vmem:[%s621_s2 + $0x8] sm:$0xff]   ;;  %v475_v1 = vmov 0.0   ;;  %v429_v2 = vld [vmem:[%s621_s2] sm:$0xff]   ;;  %vm476_vm0 = vmmov 0   ;;  %s30_s29 = sld [smem:[#allocation4]]  ;;  %v430_v3 = vld [vmem:[%s623_s4 + $0x38] sm:$0xff]  }
  0x10   :  { %396 = vmatprep.subr.bf16.mxu0 %v475_v1  ;;  %404 = vmatprep.subr.bf16.mxu1 %v475_v1  ;;  %s313_s30 = sld [smem:[#allocation4 + $0x1]]  ;;  %v431_v4 = vld [vmem:[%s623_s4 + $0x30] sm:$0xff]   ;;  %v432_v5 = vld [vmem:[%s623_s4 + $0x28] sm:$0xff]  }
  0x11   :  { %397 = vmatpush3.bf16.msra.mxu0 %v428_v0  ;;  %400 = vmatprep.mubr.msk.bf16.mxu0 %vm476_vm0, %v475_v1  ;;  %s533_s11 = sld [smem:[#allocation4 + $0x2]] }
  0x12   :  { %398 = vmatprep.subr.bf16.mxu0 %v475_v1  ;;  %420 = vmatprep.mubr.msk.bf16.mxu1 %vm476_vm0, %v475_v1  ;;  %s535_s2 = sld [smem:[#allocation4 + $0x3]] }
  0x13   :  { %405 = vmatpush3.bf16.msra.mxu1 %v430_v3  ;;  %s537_s12 = sld [smem:[#allocation4 + $0x4]] }
  0x14   :  { %406 = vmatprep.subr.bf16.mxu1 %v475_v1  ;;  %s540_s13 = sld [smem:[#allocation4 + $0x5]] }
  0x15   :  { %399 = vmatpush3.bf16.msra.mxu0 %v429_v2  ;;  %p31_p5 = scmp.gt.s32.totalorder %s30_s29, 0  ;;  %p308_p6 = scmp.lt.s32.totalorder %s30_s29, 63 }
  0x16   :  { %p41_p7 = scmp.gt.s32.totalorder %s313_s30, 0  ;;  %p314_p8 = scmp.lt.s32.totalorder %s313_s30, 63 }
  0x17   :  { %407 = vmatpush3.bf16.msra.mxu1 %v431_v4  ;;  %s627_s29 = smov (!%p31_p5, %s30_s29), 0 }
  0x18   :  { %408 = vmatprep.subr.bf16.mxu1 %v475_v1  ;;  %s629_s30 = smov (!%p41_p7, %s313_s30), 0  ;;  %s631_s29 = smov (!%p308_p6, %s627_s29), 63 }
  0x19   :  { %17 = vsyncpa [#allocation6], 0  ;;  %vm37_vm1 = vcmask 253952   ;;  %s633_s30 = smov (!%p314_p8, %s629_s30), 63  ;;  %v433_v6 = vld [vmem:[%s623_s4 + $0x20] sm:$0xff]   ;;  %s35_s20 = scalar_lea.vmem %s620_s1, %s631_s29  ;;  %v434_v9 = vld [vmem:[%s623_s4 + $0x18] sm:$0xff]  }
  0x1a   :  { %p50_p9 = scmp.gt.s32.totalorder %s533_s11, 0  ;;  %v36_v7 = vld [vmem:[%s35_s20] sm:$0x1]  ;;  %s45_s23 = scalar_lea.vmem %s620_s1, %s633_s30  ;;  %v435_v11 = vld [vmem:[%s623_s4 + $0x10] sm:$0xff]   ;;  %vm127_vm2 = vcmask 261120   ;;  %v436_v19 = vld [vmem:[%s623_s4 + $0x8] sm:$0xff]  }
  0x1b   :  { %409 = vmatpush3.bf16.msra.mxu1 %v432_v5  ;;  %p320_p10 = scmp.lt.s32.totalorder %s533_s11, 63  ;;  %38 = vst.msk [vmem:[#allocation2] sm:$0x1] %vm37_vm1, %v36_v7  ;;  %v46_v8 = vld [vmem:[%s45_s23] sm:$0x1]  ;;  %p59_p11 = scmp.gt.s32.totalorder %s535_s2, 0 }
  0x1c   :  { %410 = vmatprep.subr.bf16.mxu1 %v475_v1  ;;  %s635_s11 = smov (!%p50_p9, %s533_s11), 0  ;;  %47 = vst.msk [vmem:[#allocation2 + $0x1] sm:$0x1] %vm37_vm1, %v46_v8  ;;  %p326_p12 = scmp.lt.s32.totalorder %s535_s2, 63  ;;  %v437_v20 = vld [vmem:[%s623_s4] sm:$0xff]  }
  0x1d   :  { %s637_s11 = smov (!%p320_p10, %s635_s11), 63  ;;  %s639_s2 = smov (!%p59_p11, %s535_s2), 0  ;;  %v355_v21 = vld [vmem:[%s622_s3] ss:$0 sm:$0xff] }
  0x1e   :  { %s54_s0 = scalar_lea.vmem %s620_s1, %s637_s11  ;;  %p68_p13 = scmp.gt.s32.totalorder %s537_s12, 0  ;;  %v359_v29 = vld [vmem:[%s624_s5] ss:$0 sm:$0xff] }
  0x1f   :  { %411 = vmatpush3.bf16.msra.mxu1 %v433_v6  ;;  %v55_v10 = vld [vmem:[%s54_s0] sm:$0x1]  ;;  %s641_s2 = smov (!%p326_p12, %s639_s2), 63  ;;  %p332_p0 = scmp.lt.s32.totalorder %s537_s12, 63 }
  0x20   :  { %412 = vmatprep.subr.bf16.mxu1 %v475_v1  ;;  %56 = vst.msk [vmem:[#allocation2 + $0x2] sm:$0x1] %vm37_vm1, %v55_v10  ;;  %s69_s30 = scalar_select %p68_p13, %s537_s12, 0 }
  0x21   :  { %s63_s9 = scalar_lea.vmem %s620_s1, %s641_s2  ;;  %p77_p1 = scmp.gt.s32.totalorder %s540_s13, 0 }
  0x22   :  { %v64_v12 = vld [vmem:[%s63_s9] sm:$0x1]  ;;  %p338_p2 = scmp.lt.s32.totalorder %s540_s13, 63  ;;  %s643_s30 = smov (!%p332_p0, %s69_s30), 63 }
  0x23   :  { %413 = vmatpush3.bf16.msra.mxu1 %v434_v9  ;;  %65 = vst.msk [vmem:[#allocation2 + $0x3] sm:$0x1] %vm37_vm1, %v64_v12  ;;  %s645_s13 = smov (!%p77_p1, %s540_s13), 0  ;;  %s72_s14 = scalar_lea.vmem %s620_s1, %s643_s30 }
  0x24   :  { %414 = vmatprep.subr.bf16.mxu1 %v475_v1  ;;  %s343_s15 = sld [smem:[#allocation4 + $0x6]]  ;;  %v73_v13 = vld [vmem:[%s72_s14] sm:$0x1]  ;;  %s647_s13 = smov (!%p338_p2, %s645_s13), 63 }
  0x25   :  { %74 = vst.msk [vmem:[#allocation2 + $0x4] sm:$0x1] %vm37_vm1, %v73_v13  ;;  %s349_s2 = sld [smem:[#allocation4 + $0x7]]  ;;  %s81_s17 = scalar_lea.vmem %s620_s1, %s647_s13 }
  0x26   :  { %v82_v14 = vld [vmem:[%s81_s17] sm:$0x1]  ;;  %s477_s29 = smov [#allocation5]  }
  0x27   :  { %415 = vmatpush3.bf16.msra.mxu1 %v435_v11  ;;  %83 = vst.msk [vmem:[#allocation2 + $0x5] sm:$0x1] %vm37_vm1, %v82_v14  ;;  %s292_s4 = sshll.u32 %s477_s29, 4  ;;  %s293_s4 = int_to_ptr.vmem [resolvable:$true] %s292_s4 }
  0x28   :  { %416 = vmatprep.subr.bf16.mxu1 %v475_v1  ;;  %s450_s3 = scalar_lea.vmem %s293_s4, 128  ;;  %p455_p8 = scmp.lt.s32.totalorder %s293_s4, %s293_s4 }
  0x29   :  { %p451_p7 = scmp.ne.s32.totalorder %s293_s4, %s450_s3  ;;  %p456_p9 = scmp.lt.s32.totalorder %s450_s3, %s450_s3 }
  0x2a   :  { %p86_p3 = scmp.gt.s32.totalorder %s343_s15, 0  ;;  %p344_p4 = scmp.lt.s32.totalorder %s343_s15, 63 }
  0x2b   :  { %p95_p5 = scmp.gt.s32.totalorder %s349_s2, 0  ;;  %p350_p6 = scmp.lt.s32.totalorder %s349_s2, 63  ;;  %417 = vmatpush3.bf16.msra.mxu1 %v436_v19 }
  0x2c   :  { %s649_s15 = smov (!%p86_p3, %s343_s15), 0  ;;  %418 = vmatprep.subr.bf16.mxu1 %v475_v1  ;;  %p457_p10 = por %p456_p9, %p455_p8 }
  0x2d   :  { %s651_s15 = smov (!%p344_p4, %s649_s15), 63  ;;  %s653_s2 = smov (!%p95_p5, %s349_s2), 0 }
  0x2e   :  { %s90_s20 = scalar_lea.vmem %s620_s1, %s651_s15  ;;  %s655_s2 = smov (!%p350_p6, %s653_s2), 63 }
  0x2f   :  { %v91_v15 = vld [vmem:[%s90_s20] sm:$0x1]  ;;  %s99_s22 = scalar_lea.vmem %s620_s1, %s655_s2  ;;  %419 = vmatpush3.bf16.msra.mxu1 %v437_v20  ;;  %p458_p11 = pnand %p457_p10, %p451_p7 }
  0x30   :  { %92 = vst.msk [vmem:[#allocation2 + $0x6] sm:$0x1] %vm37_vm1, %v91_v15  ;;  %v100_v16 = vld [vmem:[%s99_s22] sm:$0x1] }
  0x31   :  { %101 = vst.msk [vmem:[#allocation2 + $0x7] sm:$0x1] %vm37_vm1, %v100_v16 }
  0x38   :  { %v102_v17 = vld [vmem:[#allocation2] sm:$0xff] }
  0x39   :  { %v108_v18 = vpack.c.bf16 %v102_v17, %v102_v17 }
  0x3b   :  { %401 = vmatmul.mubr.msk.bf16.vlgmr.msra.gmra.mxu0 %vm127_vm2, %v108_v18 }
  0xfb   :  { %v165_v22 = vpop.f32.mrf.mxu0 }
  0xfc   :  { %v166_v23 = vadd.f32 %v355_v21, %v165_v22 }
  0xfd   :  { %v402_v24 = vpop.f32.mrf.mxu0 }
  0xfe   :  { %v171_v25 = vmax.f32 %v166_v23, 0.0 }
  0xff   :  { %v168_v26 = vpop.f32.mrf.mxu0 }
 0x100   :  { %v189_v27 = vpack.c.bf16 %v171_v25, %v171_v25 }
 0x101   :  { %v403_v28 = vpop.f32.mrf.mxu0 }
 0x102   :  { %421 = vmatmul.mubr.bf16.vlgmr.msra.gmra.mxu1 %v189_v27 }
 0x1c2   :  { %v278_v30 = vpop.f32.mrf.mxu1 }
 0x1c3   :  { %v279_v31 = vadd.f32 %v359_v29, %v278_v30 }
 0x1c4   :  { %v422_v32 = vpop.f32.mrf.mxu1 }
 0x1c5   :  { %v284_v33 = vmax.f32 %v279_v31, 0.0 }
 0x1c6   :  { %v281_v34 = vpop.f32.mrf.mxu1 }
 0x1c7   :  { %285 = vst [vmem:[#allocation5] sm:$0xff] %v284_v33 }
 0x1c8   :  { %v423_v35 = vpop.f32.mrf.mxu1 }
 0x1c9   :  { %461 = shalt.err (!%p458_p11)
}
 0x1ca   :  { %295 = dma.vmem_to_hbm [thread:$0]  %s293_s4, 128, %s625_s6, [#allocation6]  }
 0x1cb   :  { %472 = dma.done.wait [#allocation6], 128  }
 0x1cc   :  { %473 = vsyncadd [#allocation6], 4294967168 }
 0x1cd   :  { %299 = vsyncpa [#allocation6], 1 }

// kernel: tpu_custom_call.1
= control target key start
LH: loop header
LB: loop body
LE: loop exit
PB: predicated region body
PF: predicated region fallthrough
CT: control target
= control target key end

     0   :  { %s619_s0 = inlined_call_operand.vmem [shape: s32[8], index: 0, kind: input, shape index: {}]   ;;  %s620_s1 = inlined_call_operand.vmem [shape: f32[64,32], index: 1, kind: input, shape index: {}]   ;;  %s621_s2 = inlined_call_operand.vmem [shape: bf16[32,128], index: 2, kind: input, shape index: {}]   ;;  %s622_s3 = inlined_call_operand.vmem [shape: f32[1,128], index: 3, kind: input, shape index: {}]   ;;  %s623_s4 = inlined_call_operand.vmem [shape: bf16[128,128], index: 4, kind: input, shape index: {}]   ;;  %s624_s5 = inlined_call_operand.vmem [shape: f32[1,128], index: 5, kind: input, shape index: {}]   ;;  %s625_s6 = inlined_call_operand.hbm [shape: f32[8,128], index: 6, kind: output, shape index: {}]  }
   0x1   :  { %s11_s23 = sshll.u32 %s619_s0, 4  ;;  %s12_s23 = int_to_ptr.vmem [resolvable:$true] %s11_s23 }
   0x2   :  { %s438_s24 = scalar_lea.vmem %s12_s23, 16  ;;  %p443_p1 = scmp.lt.s32.totalorder %s12_s23, %s12_s23 }
   0x3   :  { %p439_p0 = scmp.ne.s32.totalorder %s12_s23, %s438_s24  ;;  %p444_p2 = scmp.lt.s32.totalorder %s438_s24, %s438_s24 }
   0x5   :  { %p445_p3 = por %p444_p2, %p443_p1 }
   0x7   :  { %p446_p4 = pnand %p445_p3, %p439_p0 }
   0x9   :  { %449 = shalt.err (!%p446_p4)  }
   0xa   :  { %s474_s25 = smov [#allocation4]  }
   0xb   :  { %14 = dma.vmem_to_smem %s12_s23, 16, %s474_s25, [#allocation3] }
   0xc   :  { %470 = dma.done.wait [#allocation3], 16 }
   0xd   :  { %471 = vsyncadd [#allocation3], 4294967280 }
   0xe   :  { %16 = sfence }
   0xf   :  { %v428_v0 = vld [vmem:[%s621_s2 + $0x8] sm:$0xff]   ;;  %v475_v1 = vmov 0.0   ;;  %v429_v2 = vld [vmem:[%s621_s2] sm:$0xff]   ;;  %vm476_vm0 = vmmov 0   ;;  %s30_s29 = sld [smem:[#allocation4]]  ;;  %v430_v3 = vld [vmem:[%s623_s4 + $0x38] sm:$0xff]  }
  0x10   :  { %396 = vmatprep.subr.bf16.mxu0 %v475_v1  ;;  %404 = vmatprep.subr.bf16.mxu1 %v475_v1  ;;  %s313_s30 = sld [smem:[#allocation4 + $0x1]]  ;;  %v431_v4 = vld [vmem:[%s623_s4 + $0x30] sm:$0xff]   ;;  %v432_v5 = vld [vmem:[%s623_s4 + $0x28] sm:$0xff]  }
  0x11   :  { %397 = vmatpush3.bf16.msra.mxu0 %v428_v0  ;;  %400 = vmatprep.mubr.msk.bf16.mxu0 %vm476_vm0, %v475_v1  ;;  %s533_s11 = sld [smem:[#allocation4 + $0x2]] }
  0x12   :  { %398 = vmatprep.subr.bf16.mxu0 %v475_v1  ;;  %420 = vmatprep.mubr.msk.bf16.mxu1 %vm476_vm0, %v475_v1  ;;  %s535_s2 = sld [smem:[#allocation4 + $0x3]] }
  0x13   :  { %405 = vmatpush3.bf16.msra.mxu1 %v430_v3  ;;  %s537_s12 = sld [smem:[#allocation4 + $0x4]] }
  0x14   :  { %406 = vmatprep.subr.bf16.mxu1 %v475_v1  ;;  %s540_s13 = sld [smem:[#allocation4 + $0x5]] }
  0x15   :  { %399 = vmatpush3.bf16.msra.mxu0 %v429_v2  ;;  %p31_p5 = scmp.gt.s32.totalorder %s30_s29, 0  ;;  %p308_p6 = scmp.lt.s32.totalorder %s30_s29, 63 }
  0x16   :  { %p41_p7 = scmp.gt.s32.totalorder %s313_s30, 0  ;;  %p314_p8 = scmp.lt.s32.totalorder %s313_s30, 63 }
  0x17   :  { %407 = vmatpush3.bf16.msra.mxu1 %v431_v4  ;;  %s627_s29 = smov (!%p31_p5, %s30_s29), 0 }
  0x18   :  { %408 = vmatprep.subr.bf16.mxu1 %v475_v1  ;;  %s629_s30 = smov (!%p41_p7, %s313_s30), 0  ;;  %s631_s29 = smov (!%p308_p6, %s627_s29), 63 }
  0x19   :  { %17 = vsyncpa [#allocation6], 0  ;;  %vm37_vm1 = vcmask 253952   ;;  %s633_s30 = smov (!%p314_p8, %s629_s30), 63  ;;  %v433_v6 = vld [vmem:[%s623_s4 + $0x20] sm:$0xff]   ;;  %s35_s20 = scalar_lea.vmem %s620_s1, %s631_s29  ;;  %v434_v9 = vld [vmem:[%s623_s4 + $0x18] sm:$0xff]  }
  0x1a   :  { %p50_p9 = scmp.gt.s32.totalorder %s533_s11, 0  ;;  %v36_v7 = vld [vmem:[%s35_s20] sm:$0x1]  ;;  %s45_s23 = scalar_lea.vmem %s620_s1, %s633_s30  ;;  %v435_v11 = vld [vmem:[%s623_s4 + $0x10] sm:$0xff]   ;;  %vm127_vm2 = vcmask 261120   ;;  %v436_v19 = vld [vmem:[%s623_s4 + $0x8] sm:$0xff]  }
  0x1b   :  { %409 = vmatpush3.bf16.msra.mxu1 %v432_v5  ;;  %p320_p10 = scmp.lt.s32.totalorder %s533_s11, 63  ;;  %38 = vst.msk [vmem:[#allocation2] sm:$0x1] %vm37_vm1, %v36_v7  ;;  %v46_v8 = vld [vmem:[%s45_s23] sm:$0x1]  ;;  %p59_p11 = scmp.gt.s32.totalorder %s535_s2, 0 }
  0x1c   :  { %410 = vmatprep.subr.bf16.mxu1 %v475_v1  ;;  %s635_s11 = smov (!%p50_p9, %s533_s11), 0  ;;  %47 = vst.msk [vmem:[#allocation2 + $0x1] sm:$0x1] %vm37_vm1, %v46_v8  ;;  %p326_p12 = scmp.lt.s32.totalorder %s535_s2, 63  ;;  %v437_v20 = vld [vmem:[%s623_s4] sm:$0xff]  }
  0x1d   :  { %s637_s11 = smov (!%p320_p10, %s635_s11), 63  ;;  %s639_s2 = smov (!%p59_p11, %s535_s2), 0  ;;  %v355_v21 = vld [vmem:[%s622_s3] ss:$0 sm:$0xff] }
  0x1e   :  { %s54_s0 = scalar_lea.vmem %s620_s1, %s637_s11  ;;  %p68_p13 = scmp.gt.s32.totalorder %s537_s12, 0  ;;  %v359_v29 = vld [vmem:[%s624_s5] ss:$0 sm:$0xff] }
  0x1f   :  { %411 = vmatpush3.bf16.msra.mxu1 %v433_v6  ;;  %v55_v10 = vld [vmem:[%s54_s0] sm:$0x1]  ;;  %s641_s2 = smov (!%p326_p12, %s639_s2), 63  ;;  %p332_p0 = scmp.lt.s32.totalorder %s537_s12, 63 }
  0x20   :  { %412 = vmatprep.subr.bf16.mxu1 %v475_v1  ;;  %56 = vst.msk [vmem:[#allocation2 + $0x2] sm:$0x1] %vm37_vm1, %v55_v10  ;;  %s69_s30 = scalar_select %p68_p13, %s537_s12, 0 }
  0x21   :  { %s63_s9 = scalar_lea.vmem %s620_s1, %s641_s2  ;;  %p77_p1 = scmp.gt.s32.totalorder %s540_s13, 0 }
  0x22   :  { %v64_v12 = vld [vmem:[%s63_s9] sm:$0x1]  ;;  %p338_p2 = scmp.lt.s32.totalorder %s540_s13, 63  ;;  %s643_s30 = smov (!%p332_p0, %s69_s30), 63 }
  0x23   :  { %413 = vmatpush3.bf16.msra.mxu1 %v434_v9  ;;  %65 = vst.msk [vmem:[#allocation2 + $0x3] sm:$0x1] %vm37_vm1, %v64_v12  ;;  %s645_s13 = smov (!%p77_p1, %s540_s13), 0  ;;  %s72_s14 = scalar_lea.vmem %s620_s1, %s643_s30 }
  0x24   :  { %414 = vmatprep.subr.bf16.mxu1 %v475_v1  ;;  %s343_s15 = sld [smem:[#allocation4 + $0x6]]  ;;  %v73_v13 = vld [vmem:[%s72_s14] sm:$0x1]  ;;  %s647_s13 = smov (!%p338_p2, %s645_s13), 63 }
  0x25   :  { %74 = vst.msk [vmem:[#allocation2 + $0x4] sm:$0x1] %vm37_vm1, %v73_v13  ;;  %s349_s2 = sld [smem:[#allocation4 + $0x7]]  ;;  %s81_s17 = scalar_lea.vmem %s620_s1, %s647_s13 }
  0x26   :  { %v82_v14 = vld [vmem:[%s81_s17] sm:$0x1]  ;;  %s477_s29 = smov [#allocation5]  }
  0x27   :  { %415 = vmatpush3.bf16.msra.mxu1 %v435_v11  ;;  %83 = vst.msk [vmem:[#allocation2 + $0x5] sm:$0x1] %vm37_vm1, %v82_v14  ;;  %s292_s4 = sshll.u32 %s477_s29, 4  ;;  %s293_s4 = int_to_ptr.vmem [resolvable:$true] %s292_s4 }
  0x28   :  { %416 = vmatprep.subr.bf16.mxu1 %v475_v1  ;;  %s450_s3 = scalar_lea.vmem %s293_s4, 128  ;;  %p455_p8 = scmp.lt.s32.totalorder %s293_s4, %s293_s4 }
  0x29   :  { %p451_p7 = scmp.ne.s32.totalorder %s293_s4, %s450_s3  ;;  %p456_p9 = scmp.lt.s32.totalorder %s450_s3, %s450_s3 }
  0x2a   :  { %p86_p3 = scmp.gt.s32.totalorder %s343_s15, 0  ;;  %p344_p4 = scmp.lt.s32.totalorder %s343_s15, 63 }
  0x2b   :  { %p95_p5 = scmp.gt.s32.totalorder %s349_s2, 0  ;;  %p350_p6 = scmp.lt.s32.totalorder %s349_s2, 63  ;;  %417 = vmatpush3.bf16.msra.mxu1 %v436_v19 }
  0x2c   :  { %s649_s15 = smov (!%p86_p3, %s343_s15), 0  ;;  %418 = vmatprep.subr.bf16.mxu1 %v475_v1  ;;  %p457_p10 = por %p456_p9, %p455_p8 }
  0x2d   :  { %s651_s15 = smov (!%p344_p4, %s649_s15), 63  ;;  %s653_s2 = smov (!%p95_p5, %s349_s2), 0 }
  0x2e   :  { %s90_s20 = scalar_lea.vmem %s620_s1, %s651_s15  ;;  %s655_s2 = smov (!%p350_p6, %s653_s2), 63 }
  0x2f   :  { %v91_v15 = vld [vmem:[%s90_s20] sm:$0x1]  ;;  %s99_s22 = scalar_lea.vmem %s620_s1, %s655_s2  ;;  %419 = vmatpush3.bf16.msra.mxu1 %v437_v20  ;;  %p458_p11 = pnand %p457_p10, %p451_p7 }
  0x30   :  { %92 = vst.msk [vmem:[#allocation2 + $0x6] sm:$0x1] %vm37_vm1, %v91_v15  ;;  %v100_v16 = vld [vmem:[%s99_s22] sm:$0x1] }
  0x31   :  { %101 = vst.msk [vmem:[#allocation2 + $0x7] sm:$0x1] %vm37_vm1, %v100_v16 }
  0x38   :  { %v102_v17 = vld [vmem:[#allocation2] sm:$0xff] }
  0x39   :  { %v108_v18 = vpack.c.bf16 %v102_v17, %v102_v17 }
  0x3b   :  { %401 = vmatmul.mubr.msk.bf16.vlgmr.msra.gmra.mxu0 %vm127_vm2, %v108_v18 }
  0xfb   :  { %v165_v22 = vpop.f32.mrf.mxu0 }
  0xfc   :  { %v166_v23 = vadd.f32 %v355_v21, %v165_v22 }
  0xfd   :  { %v402_v24 = vpop.f32.mrf.mxu0 }
  0xfe   :  { %v171_v25 = vmax.f32 %v166_v23, 0.0 }
  0xff   :  { %v168_v26 = vpop.f32.mrf.mxu0 }
 0x100   :  { %v189_v27 = vpack.c.bf16 %v171_v25, %v171_v25 }
 0x101   :  { %v403_v28 = vpop.f32.mrf.mxu0 }
 0x102   :  { %421 = vmatmul.mubr.bf16.vlgmr.msra.gmra.mxu1 %v189_v27 }
 0x1c2   :  { %v278_v30 = vpop.f32.mrf.mxu1 }
 0x1c3   :  { %v279_v31 = vadd.f32 %v359_v29, %v278_v30 }
 0x1c4   :  { %v422_v32 = vpop.f32.mrf.mxu1 }
 0x1c5   :  { %v284_v33 = vmax.f32 %v279_v31, 0.0 }
 0x1c6   :  { %v281_v34 = vpop.f32.mrf.mxu1 }
 0x1c7   :  { %285 = vst [vmem:[#allocation5] sm:$0xff] %v284_v33 }
 0x1c8   :  { %v423_v35 = vpop.f32.mrf.mxu1 }
 0x1c9   :  { %461 = shalt.err (!%p458_p11)
}
 0x1ca   :  { %295 = dma.vmem_to_hbm [thread:$0]  %s293_s4, 128, %s625_s6, [#allocation6]  }
 0x1cb   :  { %472 = dma.done.wait [#allocation6], 128  }
 0x1cc   :  { %473 = vsyncadd [#allocation6], 4294967168 }
 0x1cd   :  { %299 = vsyncpa [#allocation6], 1 }

</bundles_post_ra>
